<compile_context>
chip_gen: v7x
topology: tpu7x:2x2x1
jax: 0.10.0
libtpu: 0.0.40
codegen_flags: <defaults>
</compile_context>

<pallas_src>
import jax
import jax.numpy as jnp
from jax.experimental import pallas as pl
from jax.experimental.pallas import tpu as pltpu


def _attn_general_kernel(hid_ref, w_ref, enc_ref, out_ref, e_scratch):
    # hid_ref   : (TB, H)      batch tile of decoder hidden states
    # w_ref     : (H, H)       nn.Linear weight (out_features, in_features)
    # enc_ref   : (TS, TB, H)  S-chunk of encoder outputs, native seq-major layout
    # out_ref   : (TB, S)      lane-dense attention weights (resident across the S axis)
    # e_scratch : (S, TB) f32  energy accumulator (resident across the S axis)
    s_idx = pl.program_id(1)
    ts = enc_ref.shape[0]

    # q[b, h] = sum_o hid[b, o] * W[o, h]  (== W^T hid_b).  The Linear bias is
    # constant over the sequence axis and cancels exactly under softmax.
    q = jnp.dot(hid_ref[...], w_ref[...], preferred_element_type=jnp.float32)   # (TB, H) MXU

    enc = enc_ref[...]
    # Multiply in the encoder dtype (keeps bf16 inputs bf16 on the VPU),
    # accumulate the H-reduction in f32.
    prod = enc * q.astype(enc.dtype)[None, :, :]                                 # (TS, TB, H) VPU
    e_chunk = jnp.sum(prod.astype(jnp.float32), axis=-1)                         # (TS, TB)   XLU

    off = pl.multiple_of(s_idx * ts, ts)
    e_scratch[pl.ds(off, ts), :] = e_chunk

    @pl.when(s_idx == pl.num_programs(1) - 1)
    def _():
        # One small XLU transpose of the tiny energy tile -> lane-dense (TB, S).
        e = e_scratch[...].T                                  # (TB, S)  f32
        m = jnp.max(e, axis=-1, keepdims=True)                # (TB, 1)
        p = jnp.exp(e - m)                                    # (TB, S)  EUP, lane-dense
        denom = jnp.sum(p, axis=-1, keepdims=True)            # (TB, 1)
        out_ref[...] = (p / denom).astype(out_ref.dtype)      # exact divide: rows sum to 1


def _divisors_desc(n):
    return [d for d in range(n, 0, -1) if n % d == 0]


def _vmem_need_bytes(S, H, tb, ts, enc_itemsize, out_itemsize):
    return (2 * ts * tb * H * enc_itemsize     # double-buffered encoder block
            + 2 * tb * H * enc_itemsize        # hidden block
            + 2 * H * H * 4                    # weight block (constant index -> loaded once)
            + 2 * tb * S * out_itemsize        # output block (resident over the S axis)
            + tb * S * 4)                      # f32 energy scratch


def _pick_tiles(S, B, H, enc_itemsize, out_itemsize, budget_bytes):
    """Largest (tb, ts) tiles whose VMEM working set fits the budget."""
    tb_cands = [d for d in _divisors_desc(B) if d == B or d % 8 == 0] or [B]
    ts_cands = [d for d in _divisors_desc(S) if d == S or d % 8 == 0] or [S]
    for tb in tb_cands:          # prefer the fattest batch tile (DMA burst = tb*H elems)
        for ts in ts_cands:      # then the longest sequence chunk
            if _vmem_need_bytes(S, H, tb, ts, enc_itemsize, out_itemsize) <= budget_bytes:
                return tb, ts
    return tb_cands[-1], ts_cands[-1]


def attn_general(hidden, encoder_outputs, weight, bias=None, *, tb=None, ts=None,
                 vmem_budget_bytes=24 * 1024 * 1024):
    """hidden: (1, B, H); encoder_outputs: (S, B, H); weight: (H, H); bias: (H,).

    Returns softmax attention weights of shape (B, 1, S) in hidden.dtype.
    `bias` is accepted for API parity; it adds a per-row constant to the
    energies which cancels exactly under softmax, so it is never read.
    """
    S, B, H = encoder_outputs.shape
    assert hidden.shape == (1, B, H)
    assert weight.shape == (H, H)
    hid = hidden.reshape(B, H)                      # squeeze, no data movement

    enc_itemsize = jnp.dtype(encoder_outputs.dtype).itemsize
    out_dtype = hidden.dtype
    out_itemsize = jnp.dtype(out_dtype).itemsize

    auto_tb, auto_ts = _pick_tiles(S, B, H, enc_itemsize, out_itemsize, vmem_budget_bytes)
    tb = auto_tb if tb is None else tb
    ts = auto_ts if ts is None else ts
    assert B % tb == 0 and S % ts == 0, "tiles must divide the batch / sequence dims"
    grid_b, grid_s = B // tb, S // ts

    # Explicit scoped-VMEM limit (v5e default is only 16 MiB); cap at v7x's 64 MiB physical.
    need = _vmem_need_bytes(S, H, tb, ts, enc_itemsize, out_itemsize)
    vmem_limit = int(min(64 << 20, max(need + (4 << 20), 16 << 20)))

    out = pl.pallas_call(
        _attn_general_kernel,
        out_shape=jax.ShapeDtypeStruct((B, S), out_dtype),
        grid_spec=pltpu.PrefetchScalarGridSpec(
            num_scalar_prefetch=0,
            grid=(grid_b, grid_s),
            in_specs=[
                pl.BlockSpec((tb, H), lambda b, s: (b, 0)),         # hidden batch tile
                pl.BlockSpec((H, H), lambda b, s: (0, 0)),          # W, constant block
                pl.BlockSpec((ts, tb, H), lambda b, s: (s, b, 0)),  # strided enc slice, no HBM transpose
            ],
            out_specs=pl.BlockSpec((tb, S), lambda b, s: (b, 0)),   # lane-dense output block
            scratch_shapes=[pltpu.VMEM((S, tb), jnp.float32)],      # energy accumulator
        ),
        compiler_params=pltpu.CompilerParams(
            dimension_semantics=("parallel", "arbitrary"),          # batch tiles independent; S accumulates
            vmem_limit_bytes=vmem_limit,
        ),
    )(hid, weight, encoder_outputs)

    return out[:, None, :]                          # (B, 1, S), matches .unsqueeze(1)


def attn_general_ref(hidden, encoder_outputs, weight, bias):
    """Pure-JAX reference mirroring the PyTorch loops (including the bias)."""
    proj = jnp.einsum("sbh,oh->sbo", encoder_outputs, weight) + bias   # (S, B, H)
    e = jnp.einsum("bh,sbh->bs", hidden[0], proj)                      # (B, S)
    return jax.nn.softmax(e, axis=1)[:, None, :]                       # (B, 1, S)


def _run_case(S, B, H, key, bias_scale=1.0, tb=None, ts=None):
    k1, k2, k3, k4 = jax.random.split(key, 4)
    hidden = jax.random.normal(k1, (1, B, H), dtype=jnp.float32)
    encoder_outputs = jax.random.normal(k2, (S, B, H), dtype=jnp.float32)

    # Deterministic nn.Linear(H, H) parameters (synthetic init).
    bound = 1.0 / float(H) ** 0.5
    weight = jax.random.uniform(k3, (H, H), minval=-bound, maxval=bound, dtype=jnp.float32)
    bias = bias_scale * jax.random.uniform(k4, (H,), minval=-bound, maxval=bound,
                                           dtype=jnp.float32)

    out = jax.block_until_ready(attn_general(hidden, encoder_outputs, weight, bias,
                                             tb=tb, ts=ts))
    ref = attn_general_ref(hidden, encoder_outputs, weight, bias)

    assert out.shape == (B, 1, S)
    assert jnp.allclose(out, ref, atol=2e-3, rtol=2e-3), "mismatch vs reference"
    assert jnp.allclose(jnp.sum(out, axis=-1), 1.0, atol=1e-3), "rows do not sum to 1"


if __name__ == "__main__":
    key = jax.random.PRNGKey(0)
    k_a, k_b, k_c = jax.random.split(key, 3)

    # Single-step path (tb=B, ts=S): lane-dense output, one grid step.
    _run_case(S=16, B=16, H=128, key=k_a)
    # Small / non-multiple-of-8 batch path (full-dim blocks are always legal).
    _run_case(S=8, B=2, H=32, key=k_b)
    # Tiled path: grid=(2, 2) exercises the 'parallel' batch axis, the
    # 'arbitrary' S axis (energy accumulation + epilogue softmax) and the
    # large-bias cancellation under softmax.
    _run_case(S=16, B=16, H=128, key=k_c, bias_scale=8.0, tb=8, ts=8)

    print("KERNEL_OK")
</pallas_src>

<mosaic_0001>
module attributes {stable_mosaic.version = 11 : i64} {
  func.func @_attn_general_kernel(%arg0: i32, %arg1: i32, %arg2: memref<16x128xf32, #tpu.memory_space<vmem>>, %arg3: memref<128x128xf32, #tpu.memory_space<vmem>>, %arg4: memref<16x16x128xf32, #tpu.memory_space<vmem>>, %arg5: memref<16x16xf32, #tpu.memory_space<vmem>>, %arg6: memref<16x16xf32, #tpu.memory_space<vmem>>) attributes {dimension_semantics = [#tpu.dimension_semantics<parallel>, #tpu.dimension_semantics<arbitrary>], iteration_bounds = array<i64: 1, 1>, scalar_prefetch = 0 : i64, scratch_operands = 1 : i64, tpu.core_type = #tpu.core_type<tc>, window_params = [{transform_indices = @transform_0, window_bounds = array<i64: 16, 128>}, {pipeline_mode = #tpu.pipeline_mode<synchronous>, transform_indices = @transform_1, window_bounds = array<i64: 128, 128>}, {transform_indices = @transform_2, window_bounds = array<i64: 16, 16, 128>}, {transform_indices = @transform_3, window_bounds = array<i64: 16, 16>}]} {
    %c0 = arith.constant 0 : index
    %c0_0 = arith.constant 0 : index
    %0 = vector.load %arg2[%c0, %c0_0] : memref<16x128xf32, #tpu.memory_space<vmem>>, vector<16x128xf32>
    %c0_1 = arith.constant 0 : index
    %c0_2 = arith.constant 0 : index
    %1 = vector.load %arg3[%c0_1, %c0_2] : memref<128x128xf32, #tpu.memory_space<vmem>>, vector<128x128xf32>
    %cst = arith.constant dense<0.000000e+00> : vector<16x128xf32>
    %2 = tpu.matmul %0, %1, %cst {dimension_numbers = #tpu.dot_dimension_numbers<[1], [0], [0], [1], [0, 0, 1, 1], [], []>} : vector<16x128xf32>, vector<128x128xf32>, vector<16x128xf32> -> vector<16x128xf32>
    %c0_3 = arith.constant 0 : index
    %c0_4 = arith.constant 0 : index
    %c0_5 = arith.constant 0 : index
    %3 = vector.load %arg4[%c0_3, %c0_4, %c0_5] : memref<16x16x128xf32, #tpu.memory_space<vmem>>, vector<16x16x128xf32>
    %4 = vector.shape_cast %2 : vector<16x128xf32> to vector<1x16x128xf32>
    %5 = vector.broadcast %4 : vector<1x16x128xf32> to vector<16x16x128xf32>
    %6 = arith.mulf %3, %5 : vector<16x16x128xf32>
    %cst_6 = arith.constant dense<0.000000e+00> : vector<16x16xf32>
    %7 = vector.multi_reduction <add>, %6, %cst_6 [2] : vector<16x16x128xf32> to vector<16x16xf32>
    %c16_i32 = arith.constant 16 : i32
    %8 = arith.muli %arg1, %c16_i32 : i32
    %9 = tpu.assume_multiple %8, 16 : i32
    %10 = arith.index_cast %9 : i32 to index
    %c0_7 = arith.constant 0 : index
    %11 = vector.load %arg6[%10, %c0_7] : memref<16x16xf32, #tpu.memory_space<vmem>>, vector<16x16xf32>
    tpu.vector_store %arg6[%10, %c0_7], %7 {strides = array<i32>} : memref<16x16xf32, #tpu.memory_space<vmem>>, vector<16x16xf32>,
    %c0_i32 = arith.constant 0 : i32
    %12 = arith.cmpi eq, %arg1, %c0_i32 : i32
    %13 = arith.extui %12 : i1 to i32
    %c0_i32_8 = arith.constant 0 : i32
    %14 = arith.cmpi ne, %13, %c0_i32_8 : i32
    scf.if %14 {
      %c0_9 = arith.constant 0 : index
      %c0_10 = arith.constant 0 : index
      %15 = vector.load %arg6[%c0_9, %c0_10] : memref<16x16xf32, #tpu.memory_space<vmem>>, vector<16x16xf32>
      %16 = tpu.transpose %15, [1, 0] : vector<16x16xf32> -> vector<16x16xf32>
      %cst_11 = arith.constant dense<0xFF800000> : vector<16xf32>
      %17 = vector.multi_reduction <maximumf>, %16, %cst_11 [1] : vector<16x16xf32> to vector<16xf32>
      %18 = vector.shape_cast %17 : vector<16xf32> to vector<16x1xf32>
      %19 = vector.broadcast %18 : vector<16x1xf32> to vector<16x16xf32>
      %20 = arith.subf %16, %19 : vector<16x16xf32>
      %21 = math.exp %20 : vector<16x16xf32>
      %cst_12 = arith.constant dense<0.000000e+00> : vector<16xf32>
      %22 = vector.multi_reduction <add>, %21, %cst_12 [1] : vector<16x16xf32> to vector<16xf32>
      %23 = vector.shape_cast %22 : vector<16xf32> to vector<16x1xf32>
      %24 = vector.broadcast %23 : vector<16x1xf32> to vector<16x16xf32>
      %25 = arith.divf %21, %24 : vector<16x16xf32>
      %c0_13 = arith.constant 0 : index
      %c0_14 = arith.constant 0 : index
      %26 = vector.load %arg5[%c0_13, %c0_14] : memref<16x16xf32, #tpu.memory_space<vmem>>, vector<16x16xf32>
      tpu.vector_store %arg5[%c0_13, %c0_14], %25 {strides = array<i32>} : memref<16x16xf32, #tpu.memory_space<vmem>>, vector<16x16xf32>,
    } else {
    }
    return
  }
  func.func @transform_0(%arg0: i32, %arg1: i32) -> (i32, i32) {
    %c0_i32 = arith.constant 0 : i32
    %c0_i32_0 = arith.constant 0 : i32
    return %arg0, %c0_i32 : i32, i32
  }
  func.func @transform_1(%arg0: i32, %arg1: i32) -> (i32, i32) {
    %c0_i32 = arith.constant 0 : i32
    %c0_i32_0 = arith.constant 0 : i32
    %c0_i32_1 = arith.constant 0 : i32
    return %c0_i32, %c0_i32_0 : i32, i32
  }
  func.func @transform_2(%arg0: i32, %arg1: i32) -> (i32, i32, i32) {
    %c0_i32 = arith.constant 0 : i32
    %c0_i32_0 = arith.constant 0 : i32
    return %arg1, %arg0, %c0_i32 : i32, i32, i32
  }
  func.func @transform_3(%arg0: i32, %arg1: i32) -> (i32, i32) {
    %c0_i32 = arith.constant 0 : i32
    %c0_i32_0 = arith.constant 0 : i32
    return %arg0, %c0_i32 : i32, i32
  }
}

</mosaic_0001>

<bundles_post_ra>
// kernel: tpu_custom_call.1
= control target key start
LH: loop header
LB: loop body
LE: loop exit
PB: predicated region body
PF: predicated region fallthrough
CT: control target
= control target key end

     0   :  { %8 = vsyncpa [#allocation4], 0  ;;  %s980_s0 = inlined_call_operand.hbm [shape: f32[16,128], index: 0, kind: input, shape index: {}]   ;;  %s981_s1 = inlined_call_operand.hbm [shape: f32[128,128], index: 1, kind: input, shape index: {}]   ;;  %s982_s2 = inlined_call_operand.hbm [shape: f32[16,16,128], index: 2, kind: input, shape index: {}]   ;;  %s983_s3 = inlined_call_operand.hbm [shape: f32[16,16], index: 3, kind: output, shape index: {}]  }
   0x1   :  { %9 = vsyncpa [#allocation7], 0 }
   0x2   :  { %10 = vsyncpa [#allocation5], 0  ;;  %s759_s12 = smov [#allocation6]   ;;  %s760_s14 = smov [#allocation3]  }
   0x3   :  { %s28_s13 = sshll.u32 %s759_s12, 4  ;;  %s16_s15 = sshll.u32 %s760_s14, 4  ;;  %s29_s13 = int_to_ptr.vmem [resolvable:$true] %s28_s13  ;;  %s785_s15 = int_to_ptr.vmem [resolvable:$true] %s16_s15 }
   0x4   :  { %s665_s18 = scalar_lea.hbm %s981_s1, 2048 }
   0x5   :  { %p666_p0 = scmp.ne.s32.totalorder %s981_s1, %s665_s18  ;;  %p669_p1 = scmp.lt.u32.totalorder %s665_s18, %s981_s1 }
   0x7   :  { %p671_p2 = pnand %p669_p1, %p666_p0 }
   0x9   :  { %674 = shalt.err (!%p671_p2)
}
   0xa   :  { %s675_s23 = scalar_lea.vmem %s29_s13, 2048  ;;  %p680_p4 = scmp.lt.s32.totalorder %s29_s13, %s29_s13 }
   0xb   :  { %p676_p3 = scmp.ne.s32.totalorder %s29_s13, %s675_s23  ;;  %p681_p5 = scmp.lt.s32.totalorder %s675_s23, %s675_s23 }
   0xd   :  { %p682_p6 = por %p681_p5, %p680_p4 }
   0xf   :  { %p683_p7 = pnand %p682_p6, %p676_p3 }
  0x11   :  { %686 = shalt.err (!%p683_p7)
}
  0x12   :  { %s761_s24 = smov 128   ;;  %s762_s25 = smov 8  }
  0x13   :  { %34 = dma.hbm_to_vmem [thread:$0]  %s981_s1, 2048, %s29_s13, [#allocation7], %s761_s24, %s761_s24, %s762_s25  }
  0x14   :  { %s687_s30 = scalar_lea.hbm %s980_s0, 256 }
  0x15   :  { %p688_p8 = scmp.ne.s32.totalorder %s980_s0, %s687_s30  ;;  %p691_p9 = scmp.lt.u32.totalorder %s687_s30, %s980_s0 }
  0x17   :  { %p693_p10 = pnand %p691_p9, %p688_p8 }
  0x19   :  { %696 = shalt.err (!%p693_p10)
}
  0x1a   :  { %s697_s8 = scalar_lea.vmem %s785_s15, 256  ;;  %p702_p12 = scmp.lt.s32.totalorder %s785_s15, %s785_s15 }
  0x1b   :  { %p698_p11 = scmp.ne.s32.totalorder %s785_s15, %s697_s8  ;;  %p703_p13 = scmp.lt.s32.totalorder %s697_s8, %s697_s8 }
  0x1d   :  { %p704_p0 = por %p703_p13, %p702_p12 }
  0x1f   :  { %p705_p1 = pnand %p704_p0, %p698_p11 }
  0x21   :  { %708 = shalt.err (!%p705_p1)
}
  0x22   :  { %22 = dma.hbm_to_vmem [thread:$0]  %s980_s0, 256, %s785_s15, [#allocation4], %s761_s24, %s761_s24, %s762_s25  }
  0x23   :  { %s763_s10 = smov [#allocation8]   ;;  %s709_s14 = scalar_lea.hbm %s982_s2, 4096 }
  0x24   :  { %s40_s11 = sshll.u32 %s763_s10, 4  ;;  %p710_p2 = scmp.ne.s32.totalorder %s982_s2, %s709_s14  ;;  %s41_s11 = int_to_ptr.vmem [resolvable:$true] %s40_s11 }
  0x25   :  { %p713_p3 = scmp.lt.u32.totalorder %s709_s14, %s982_s2 }
  0x27   :  { %p715_p4 = pnand %p713_p3, %p710_p2 }
  0x29   :  { %718 = shalt.err (!%p715_p4)
}
  0x2a   :  { %s719_s20 = scalar_lea.vmem %s41_s11, 4096  ;;  %p724_p6 = scmp.lt.s32.totalorder %s41_s11, %s41_s11 }
  0x2b   :  { %p720_p5 = scmp.ne.s32.totalorder %s41_s11, %s719_s20  ;;  %p725_p7 = scmp.lt.s32.totalorder %s719_s20, %s719_s20 }
  0x2d   :  { %p726_p8 = por %p725_p7, %p724_p6 }
  0x2f   :  { %p727_p9 = pnand %p726_p8, %p720_p5 }
  0x31   :  { %730 = shalt.err (!%p727_p9)
}
  0x32   :  { %46 = dma.hbm_to_vmem [thread:$0]  %s982_s2, 4096, %s41_s11, [#allocation7], %s761_s24, %s761_s24, %s762_s25  }
  0x33   :  { %753 = dma.done.wait [#allocation4], 256  }
  0x34   :  { %754 = vsyncadd [#allocation4], 4294967040 }
  0x35   :  { %755 = dma.done.wait [#allocation7], 6144  }
  0x36   :  { %756 = vsyncadd [#allocation7], 4294961152  ;;  %v58_v0 = vld [vmem:[#allocation6] sm:$0xff]  ;;  %v59_v1 = vld [vmem:[#allocation6 + $0x8] sm:$0xff]  ;;  %vm321_vm0 = vcmask 130112   ;;  %vm458_vm1 = vcmask 1041409  }
  0x37   :  { %v60_v2 = vld [vmem:[#allocation6 + $0x10] sm:$0xff]  ;;  %v618_v3 = vpack.c.bf16 %v59_v1, %v58_v0  ;;  %v61_v4 = vld [vmem:[#allocation6 + $0x18] sm:$0xff]  ;;  %v62_v6 = vld [vmem:[#allocation6 + $0x20] sm:$0xff]  ;;  %vm460_vm2 = vcmask 1042434   ;;  %vm462_vm3 = vcmask 1043459   ;;  %vm464_vm4 = vcmask 1044484  }
  0x38   :  { %v622_v5 = vpack.c.bf16 %v61_v4, %v60_v2  ;;  %v63_v7 = vld [vmem:[#allocation6 + $0x28] sm:$0xff]  ;;  %v56_v9 = vld [vmem:[#allocation3] sm:$0xff]  ;;  %v65_v11 = vld [vmem:[#allocation6 + $0x38] sm:$0xff]  ;;  %vm468_vm5 = vcmask 1046534   ;;  %vm466_vm6 = vcmask 1045509   ;;  %vm470_vm7 = vcmask 1047559  }
  0x39   :  { %619 = vmatprep.subr.bf16.mxu0 %v618_v3  ;;  %v626_v8 = vpack.c.bf16 %v63_v7, %v62_v6  ;;  %v64_v10 = vld [vmem:[#allocation6 + $0x30] sm:$0xff]  ;;  %615 = vmatprep.mubr.f32.mxu0 %v56_v9  ;;  %v66_v13 = vld [vmem:[#allocation6 + $0x40] sm:$0xff]  ;;  %v67_v14 = vld [vmem:[#allocation6 + $0x48] sm:$0xff]  ;;  %vm482_vm8 = vcmask 130048   ;;  %s764_s2 = smov [#allocation9]  }
  0x3a   :  { %621 = vmatpush3.bf16.msra.mxu0 %v618_v3  ;;  %v630_v12 = vpack.c.bf16 %v65_v11, %v64_v10  ;;  %v634_v15 = vpack.c.bf16 %v67_v14, %v66_v13  ;;  %v68_v16 = vld [vmem:[#allocation6 + $0x50] sm:$0xff]  ;;  %v69_v17 = vld [vmem:[#allocation6 + $0x58] sm:$0xff]  ;;  %v70_v19 = vld [vmem:[#allocation6 + $0x60] sm:$0xff]  ;;  %s552_s21 = sshll.u32 %s764_s2, 4  ;;  %s553_s21 = int_to_ptr.vmem [resolvable:$true] %s552_s21 }
  0x3b   :  { %623 = vmatprep.subr.bf16.mxu0 %v622_v5  ;;  %v638_v18 = vpack.c.bf16 %v69_v17, %v68_v16  ;;  %v71_v20 = vld [vmem:[#allocation6 + $0x68] sm:$0xff]  ;;  %v72_v22 = vld [vmem:[#allocation6 + $0x70] sm:$0xff]  ;;  %v73_v23 = vld [vmem:[#allocation6 + $0x78] sm:$0xff]  ;;  %s731_s22 = scalar_lea.vmem %s553_s21, 256  ;;  %p736_p11 = scmp.lt.s32.totalorder %s553_s21, %s553_s21 }
  0x3c   :  { %v642_v21 = vpack.c.bf16 %v71_v20, %v70_v19  ;;  %v646_v24 = vpack.c.bf16 %v73_v23, %v72_v22  ;;  %v57_v25 = vld [vmem:[#allocation3 + $0x8] sm:$0xff]  ;;  %v150_v27 = vld [vmem:[#allocation8 + $0x8] sm:$0xff]  ;;  %v149_v33 = vld [vmem:[#allocation8] sm:$0xff]  ;;  %p732_p10 = scmp.ne.s32.totalorder %s553_s21, %s731_s22  ;;  %p737_p12 = scmp.lt.s32.totalorder %s731_s22, %s731_s22 }
  0x3d   :  { %v152_v26 = vld [vmem:[#allocation8 + $0x18] sm:$0xff]  ;;  %v154_v32 = vld [vmem:[#allocation8 + $0x28] sm:$0xff]  ;;  %v153_v37 = vld [vmem:[#allocation8 + $0x20] sm:$0xff] }
  0x3e   :  { %625 = vmatpush3.bf16.msra.mxu0 %v622_v5  ;;  %v156_v36 = vld [vmem:[#allocation8 + $0x38] sm:$0xff]  ;;  %v166_v40 = vld [vmem:[#allocation8 + $0x88] sm:$0xff]  ;;  %v155_v41 = vld [vmem:[#allocation8 + $0x30] sm:$0xff]  ;;  %p738_p13 = por %p737_p12, %p736_p11 }
  0x3f   :  { %627 = vmatprep.subr.bf16.mxu0 %v626_v8  ;;  %v168_v44 = vld [vmem:[#allocation8 + $0x98] sm:$0xff]  ;;  %v165_v45 = vld [vmem:[#allocation8 + $0x80] sm:$0xff]  ;;  %v158_v48 = vld [vmem:[#allocation8 + $0x48] sm:$0xff] }
  0x40   :  { %v167_v49 = vld [vmem:[#allocation8 + $0x90] sm:$0xff]  ;;  %v170_v52 = vld [vmem:[#allocation8 + $0xa8] sm:$0xff]  ;;  %v157_v53 = vld [vmem:[#allocation8 + $0x40] sm:$0xff]  ;;  %p739_p0 = pnand %p738_p13, %p732_p10 }
  0x41   :  { %v160_v56 = vld [vmem:[#allocation8 + $0x58] sm:$0xff]  ;;  %v169_v57 = vld [vmem:[#allocation8 + $0xa0] sm:$0xff]  ;;  %v159_v61 = vld [vmem:[#allocation8 + $0x50] sm:$0xff] }
  0x42   :  { %629 = vmatpush3.bf16.msra.mxu0 %v626_v8  ;;  %v172_v60 = vld [vmem:[#allocation8 + $0xb8] sm:$0xff]  ;;  %v162_v0 = vld [vmem:[#allocation8 + $0x68] sm:$0xff]  ;;  %v171_v1 = vld [vmem:[#allocation8 + $0xb0] sm:$0xff] }
  0x43   :  { %631 = vmatprep.subr.bf16.mxu0 %v630_v12  ;;  %v174_v4 = vld [vmem:[#allocation8 + $0xc8] sm:$0xff]  ;;  %v161_v5 = vld [vmem:[#allocation8 + $0x60] sm:$0xff]  ;;  %v164_v8 = vld [vmem:[#allocation8 + $0x78] sm:$0xff] }
  0x44   :  { %v173_v9 = vld [vmem:[#allocation8 + $0xc0] sm:$0xff]  ;;  %v163_v13 = vld [vmem:[#allocation8 + $0x70] sm:$0xff]  ;;  %v178_v20 = vld [vmem:[#allocation8 + $0xe8] sm:$0xff] }
  0x45   :  { %v151_v16 = vld [vmem:[#allocation8 + $0x10] sm:$0xff] }
  0x46   :  { %633 = vmatpush3.bf16.msra.mxu0 %v630_v12  ;;  %v176_v12 = vld [vmem:[#allocation8 + $0xd8] sm:$0xff]  ;;  %v175_v17 = vld [vmem:[#allocation8 + $0xd0] sm:$0xff] }
  0x47   :  { %635 = vmatprep.subr.bf16.mxu0 %v634_v15 }
  0x4a   :  { %637 = vmatpush3.bf16.msra.mxu0 %v634_v15 }
  0x4b   :  { %639 = vmatprep.subr.bf16.mxu0 %v638_v18 }
  0x4e   :  { %641 = vmatpush3.bf16.msra.mxu0 %v638_v18 }
  0x4f   :  { %643 = vmatprep.subr.bf16.mxu0 %v642_v21 }
  0x52   :  { %645 = vmatpush3.bf16.msra.mxu0 %v642_v21  ;;  %v177_v21 = vld [vmem:[#allocation8 + $0xe0] sm:$0xff] }
  0x53   :  { %647 = vmatprep.subr.bf16.mxu0 %v646_v24 }
  0x56   :  { %649 = vmatpush3.bf16.msra.mxu0 %v646_v24  ;;  %v180_v24 = vld [vmem:[#allocation8 + $0xf8] sm:$0xff] }
  0x59   :  { %616 = vmatmul.mubr.f32.vlgmr.msra.gmra.mrb[0].mxu0 %v57_v25  ;;  %v179_v25 = vld [vmem:[#allocation8 + $0xf0] sm:$0xff] }
 0x12c   :  { %v837_v28 = vpop.f32.mrb[0].mxu0 }
 0x12d   :  { %v839_v29 = vpop.f32.mrb[1].mxu0  ;;  %v184_v30 = vmul.f32 %v837_v28, %v152_v26  ;;  %v182_v31 = vmul.f32 %v837_v28, %v150_v27  ;;  %v186_v34 = vmul.f32 %v837_v28, %v154_v32  ;;  %v188_v38 = vmul.f32 %v837_v28, %v156_v36 }
 0x12e   :  { %v181_v35 = vmul.f32 %v149_v33, %v839_v29  ;;  %v185_v39 = vmul.f32 %v153_v37, %v839_v29  ;;  %v198_v42 = vmul.f32 %v837_v28, %v166_v40  ;;  %v187_v43 = vmul.f32 %v155_v41, %v839_v29 }
 0x12f   :  { %219 = vadd.xlane.f32.xlu1 %v184_v30  ;;  %215 = vadd.xlane.f32.xlu0 %v182_v31  ;;  %v200_v46 = vmul.f32 %v837_v28, %v168_v44  ;;  %v197_v47 = vmul.f32 %v165_v45, %v839_v29  ;;  %v190_v50 = vmul.f32 %v837_v28, %v158_v48 }
 0x130   :  { %v199_v51 = vmul.f32 %v167_v49, %v839_v29  ;;  %v202_v54 = vmul.f32 %v837_v28, %v170_v52  ;;  %v189_v55 = vmul.f32 %v157_v53, %v839_v29  ;;  %v192_v58 = vmul.f32 %v837_v28, %v160_v56 }
 0x131   :  { %v201_v59 = vmul.f32 %v169_v57, %v839_v29  ;;  %v204_v62 = vmul.f32 %v837_v28, %v172_v60  ;;  %v191_v63 = vmul.f32 %v159_v61, %v839_v29  ;;  %v194_v2 = vmul.f32 %v837_v28, %v162_v0 }
 0x132   :  { %v203_v3 = vmul.f32 %v171_v1, %v839_v29  ;;  %v206_v6 = vmul.f32 %v837_v28, %v174_v4  ;;  %v193_v7 = vmul.f32 %v161_v5, %v839_v29  ;;  %v196_v10 = vmul.f32 %v837_v28, %v164_v8 }
 0x133   :  { %223 = vadd.xlane.f32.xlu1 %v186_v34  ;;  %213 = vadd.xlane.f32.xlu0 %v181_v35  ;;  %v205_v11 = vmul.f32 %v173_v9, %v839_v29  ;;  %v208_v14 = vmul.f32 %v837_v28, %v176_v12  ;;  %v195_v15 = vmul.f32 %v163_v13, %v839_v29 }
 0x134   :  { %v183_v18 = vmul.f32 %v151_v16, %v839_v29  ;;  %v207_v19 = vmul.f32 %v175_v17, %v839_v29  ;;  %v210_v22 = vmul.f32 %v837_v28, %v178_v20  ;;  %v209_v23 = vmul.f32 %v177_v21, %v839_v29 }
 0x135   :  { %v212_v26 = vmul.f32 %v837_v28, %v180_v24  ;;  %v211_v27 = vmul.f32 %v179_v25, %v839_v29 }
 0x137   :  { %227 = vadd.xlane.f32.xlu1 %v188_v38  ;;  %221 = vadd.xlane.f32.xlu0 %v185_v39 }
 0x13b   :  { %247 = vadd.xlane.f32.xlu1 %v198_v42  ;;  %225 = vadd.xlane.f32.xlu0 %v187_v43 }
 0x13f   :  { %251 = vadd.xlane.f32.xlu1 %v200_v46  ;;  %245 = vadd.xlane.f32.xlu0 %v197_v47  ;;  %v310_v46 = vlaneseq }
 0x141   :  { %v311_v49 = vand.u32 127, %v310_v46  ;;  %v313_v52 = vshrl.u32 %v310_v46, 7 }
 0x143   :  { %231 = vadd.xlane.f32.xlu1 %v190_v50  ;;  %249 = vadd.xlane.f32.xlu0 %v199_v51  ;;  %v316_v53 = vadd.s32 4294967288, %v311_v49 }
 0x145   :  { %v887_v57 = vsub.s32 %v316_v53, %v313_v52 }
 0x147   :  { %255 = vadd.xlane.f32.xlu1 %v202_v54  ;;  %229 = vadd.xlane.f32.xlu0 %v189_v55  ;;  %v883_v54 = vsub.s32 %v311_v49, %v313_v52 }
 0x14b   :  { %235 = vadd.xlane.f32.xlu1 %v192_v58  ;;  %253 = vadd.xlane.f32.xlu0 %v201_v59 }
 0x14f   :  { %259 = vadd.xlane.f32.xlu1 %v204_v62  ;;  %233 = vadd.xlane.f32.xlu0 %v191_v63 }
 0x153   :  { %239 = vadd.xlane.f32.xlu1 %v194_v2  ;;  %257 = vadd.xlane.f32.xlu0 %v203_v3 }
 0x157   :  { %263 = vadd.xlane.f32.xlu1 %v206_v6  ;;  %237 = vadd.xlane.f32.xlu0 %v193_v7 }
 0x15b   :  { %243 = vadd.xlane.f32.xlu1 %v196_v10  ;;  %261 = vadd.xlane.f32.xlu0 %v205_v11 }
 0x15f   :  { %267 = vadd.xlane.f32.xlu1 %v208_v14  ;;  %241 = vadd.xlane.f32.xlu0 %v195_v15 }
 0x163   :  { %217 = vadd.xlane.f32.xlu1 %v183_v18  ;;  %265 = vadd.xlane.f32.xlu0 %v207_v19 }
 0x167   :  { %271 = vadd.xlane.f32.xlu1 %v210_v22  ;;  %269 = vadd.xlane.f32.xlu0 %v209_v23 }
 0x16b   :  { %275 = vadd.xlane.f32.xlu1 %v212_v26  ;;  %273 = vadd.xlane.f32.xlu0 %v211_v27 }
 0x1bc   :  { %v873_v30 = vpop.xlane.xlu1 %219  ;;  %v216_v31 = vpop.xlane.xlu0 %215 }
 0x1bd   :  { %v330_v2 = vrot.slane %v873_v30, %v887_v57  ;;  %v320_v3 = vrot.slane %v216_v31, %v887_v57 }
 0x1c0   :  { %v224_v32 = vpop.xlane.xlu1 %223  ;;  %v214_v33 = vpop.xlane.xlu0 %213 }
 0x1c1   :  { %v315_v59 = vrot.slane %v214_v33, %v883_v54  ;;  %v339_v4 = vrot.slane %v224_v32, %v887_v57 }
 0x1c3   :  { %v322_v9 = vsel %vm321_vm0, %v320_v3, %v315_v59 }
 0x1c4   :  { %v228_v34 = vpop.xlane.xlu1 %227  ;;  %v222_v35 = vpop.xlane.xlu0 %221 }
 0x1c5   :  { %v335_v60 = vrot.slane %v222_v35, %v883_v54  ;;  %v348_v5 = vrot.slane %v228_v34, %v887_v57 }
 0x1c7   :  { %v340_v10 = vsel %vm321_vm0, %v339_v4, %v335_v60 }
 0x1c8   :  { %v248_v36 = vpop.xlane.xlu1 %247  ;;  %v226_v37 = vpop.xlane.xlu0 %225 }
 0x1c9   :  { %v344_v61 = vrot.slane %v226_v37, %v883_v54  ;;  %v393_v6 = vrot.slane %v248_v36, %v887_v57 }
 0x1cb   :  { %v349_v13 = vsel %vm321_vm0, %v348_v5, %v344_v61 }
 0x1cc   :  { %v252_v38 = vpop.xlane.xlu1 %251  ;;  %v246_v39 = vpop.xlane.xlu0 %245 }
 0x1cd   :  { %v402_v62 = vrot.slane %v252_v38, %v887_v57  ;;  %v389_v63 = vrot.slane %v246_v39, %v883_v54 }
 0x1cf   :  { %v394_v14 = vsel %vm321_vm0, %v393_v6, %v389_v63 }
 0x1d0   :  { %v232_v40 = vpop.xlane.xlu1 %231  ;;  %v250_v41 = vpop.xlane.xlu0 %249 }
 0x1d1   :  { %v398_v58 = vrot.slane %v250_v41, %v883_v54  ;;  %v357_v15 = vrot.slane %v232_v40, %v887_v57 }
 0x1d3   :  { %v403_v7 = vsel %vm321_vm0, %v402_v62, %v398_v58 }
 0x1d4   :  { %v256_v42 = vpop.xlane.xlu1 %255  ;;  %v230_v43 = vpop.xlane.xlu0 %229  ;;  %v472_v19 = vsel %vm458_vm1, %v403_v7, %v394_v14 }
 0x1d5   :  { %v353_v8 = vrot.slane %v230_v43, %v883_v54  ;;  %v411_v20 = vrot.slane %v256_v42, %v887_v57 }
 0x1d7   :  { %v358_v23 = vsel %vm321_vm0, %v357_v15, %v353_v8 }
 0x1d8   :  { %v875_v28 = vpop.xlane.xlu1 %235  ;;  %v254_v29 = vpop.xlane.xlu0 %253 }
 0x1d9   :  { %v407_v11 = vrot.slane %v254_v29, %v883_v54  ;;  %v366_v24 = vrot.slane %v875_v28, %v887_v57 }
 0x1db   :  { %v412_v27 = vsel %vm321_vm0, %v411_v20, %v407_v11 }
 0x1dc   :  { %v260_v44 = vpop.xlane.xlu1 %259  ;;  %v877_v45 = vpop.xlane.xlu0 %233  ;;  %v473_v43 = vsel %vm460_vm2, %v412_v27, %v472_v19 }
 0x1dd   :  { %v420_v21 = vrot.slane %v260_v44, %v887_v57  ;;  %v362_v25 = vrot.slane %v877_v45, %v883_v54 }
 0x1df   :  { %v367_v28 = vsel %vm321_vm0, %v366_v24, %v362_v25 }
 0x1e0   :  { %v879_v47 = vpop.xlane.xlu1 %239  ;;  %v258_v48 = vpop.xlane.xlu0 %257 }
 0x1e1   :  { %v416_v12 = vrot.slane %v258_v48, %v883_v54  ;;  %v375_v29 = vrot.slane %v879_v47, %v887_v57 }
 0x1e3   :  { %v421_v30 = vsel %vm321_vm0, %v420_v21, %v416_v12 }
 0x1e4   :  { %v264_v50 = vpop.xlane.xlu1 %263  ;;  %v881_v51 = vpop.xlane.xlu0 %237  ;;  %v474_v45 = vsel %vm462_vm3, %v421_v30, %v473_v43 }
 0x1e5   :  { %v429_v26 = vrot.slane %v264_v50, %v887_v57  ;;  %v371_v33 = vrot.slane %v881_v51, %v883_v54 }
 0x1e7   :  { %v376_v50 = vsel %vm321_vm0, %v375_v29, %v371_v33 }
 0x1e8   :  { %v885_v55 = vpop.xlane.xlu1 %243  ;;  %v262_v56 = vpop.xlane.xlu0 %261 }
 0x1e9   :  { %v425_v16 = vrot.slane %v262_v56, %v883_v54  ;;  %v384_v46 = vrot.slane %v885_v55, %v887_v57 }
 0x1eb   :  { %v430_v34 = vsel %vm321_vm0, %v429_v26, %v425_v16 }
 0x1ec   :  { %v268_v0 = vpop.xlane.xlu1 %267  ;;  %v242_v1 = vpop.xlane.xlu0 %241  ;;  %v475_v51 = vsel %vm464_vm4, %v430_v34, %v474_v45 }
 0x1ed   :  { %v438_v35 = vrot.slane %v268_v0, %v887_v57  ;;  %v380_v39 = vrot.slane %v242_v1, %v883_v54 }
 0x1ef   :  { %v385_v58 = vsel %vm321_vm0, %v384_v46, %v380_v39 }
 0x1f0   :  { %v218_v17 = vpop.xlane.xlu1 %217  ;;  %v266_v18 = vpop.xlane.xlu0 %265 }
 0x1f1   :  { %v326_v22 = vrot.slane %v218_v17, %v883_v54  ;;  %v434_v32 = vrot.slane %v266_v18, %v883_v54 }
 0x1f3   :  { %v331_v31 = vsel %vm321_vm0, %v330_v2, %v326_v22  ;;  %v439_v49 = vsel %vm321_vm0, %v438_v35, %v434_v32 }
 0x1f4   :  { %v459_v36 = vsel %vm458_vm1, %v331_v31, %v322_v9  ;;  %v272_v37 = vpop.xlane.xlu1 %271  ;;  %v270_v38 = vpop.xlane.xlu0 %269  ;;  %v476_v61 = vsel %vm466_vm6, %v439_v49, %v475_v51 }
 0x1f5   :  { %v461_v40 = vsel %vm460_vm2, %v340_v10, %v459_v36  ;;  %v447_v41 = vrot.slane %v272_v37, %v887_v57  ;;  %v443_v42 = vrot.slane %v270_v38, %v883_v54 }
 0x1f6   :  { %v463_v44 = vsel %vm462_vm3, %v349_v13, %v461_v40 }
 0x1f7   :  { %v465_v48 = vsel %vm464_vm4, %v358_v23, %v463_v44  ;;  %v448_v53 = vsel %vm321_vm0, %v447_v41, %v443_v42 }
 0x1f8   :  { %v467_v52 = vsel %vm466_vm6, %v367_v28, %v465_v48  ;;  %v276_v47 = vpop.xlane.xlu1 %275  ;;  %v274_v56 = vpop.xlane.xlu0 %273  ;;  %v477_v63 = vsel %vm468_vm5, %v448_v53, %v476_v61 }
 0x1f9   :  { %v469_v59 = vsel %vm468_vm5, %v376_v50, %v467_v52  ;;  %v456_v55 = vrot.slane %v276_v47, %v887_v57  ;;  %v452_v60 = vrot.slane %v274_v56, %v883_v54 }
 0x1fa   :  { %v471_v62 = vsel %vm470_vm7, %v385_v58, %v469_v59 }
 0x1fb   :  { %483 = vst.msk [vmem:[#allocation2] sm:$0xff] %vm482_vm8, %v471_v62  ;;  %v457_v0 = vsel %vm321_vm0, %v456_v55, %v452_v60 }
 0x1fc   :  { %v478_v1 = vsel %vm470_vm7, %v457_v0, %v477_v63 }
 0x1fd   :  { %484 = vst.msk [vmem:[#allocation2 + $0x8] sm:$0xff] %vm482_vm8, %v478_v1 }
 0x202   :  { %v489_v2 = vld [vmem:[#allocation2] sm:$0xff] }
 0x203   :  { %491 = vxpose.xlu0.b32.start [1/2] (short) (narrow) %v489_v2, 16 }
 0x204   :  { %v490_v3 = vld [vmem:[#allocation2 + $0x8] sm:$0xff] }
 0x207   :  { %492 = vxpose.xlu0.b32.end [2/2] (short) (narrow) %v490_v3, 16 }
 0x283   :  { %v507_v57 = vpop.trf.xlu0 }
 0x284   :  { %v523_v54 = vsel %vm482_vm8, %v507_v57, -inf }
 0x285   :  { %524 = vmax.xlane.f32.xlu1 %v523_v54 }
 0x287   :  { %v508_v4 = vpop.trf.xlu0 }
 0x288   :  { %v526_v5 = vsel %vm482_vm8, %v508_v4, -inf }
 0x289   :  { %527 = vmax.xlane.f32.xlu1 %v526_v5 }
 0x312   :  { %v525_v6 = vpop.xlane.xlu1 %524 }
 0x313   :  { %v529_v7 = vsub.f32 %v507_v57, %v525_v6 }
 0x315   :  { %v531_v8 = vmul.f32 1.442695, %v529_v7 }
 0x316   :  { %v528_v9 = vpop.xlane.xlu1 %527 }
 0x317   :  { %657 = vpow2.f32 %v531_v8  ;;  %v530_v10 = vsub.f32 %v508_v4, %v528_v9 }
 0x319   :  { %v533_v11 = vmul.f32 1.442695, %v530_v10 }
 0x31b   :  { %659 = vpow2.f32 %v533_v11 }
 0x321   :  { %v658_v12 = vpop.eup %657 }
 0x322   :  { %v535_v13 = vsel %vm482_vm8, %v658_v12, 0.0 }
 0x323   :  { %536 = vadd.xlane.f32.xlu1 %v535_v13 }
 0x325   :  { %v660_v14 = vpop.eup %659 }
 0x326   :  { %v538_v15 = vsel %vm482_vm8, %v660_v14, 0.0 }
 0x327   :  { %539 = vadd.xlane.f32.xlu1 %v538_v15 }
 0x3b0   :  { %v537_v16 = vpop.xlane.xlu1 %536 }
 0x3b1   :  { %661 = vrcp.f32 %v537_v16 }
 0x3b4   :  { %v540_v17 = vpop.xlane.xlu1 %539 }
 0x3b5   :  { %663 = vrcp.f32 %v540_v17 }
 0x3bb   :  { %v662_v18 = vpop.eup %661 }
 0x3bc   :  { %v542_v19 = vmul.f32 %v662_v18, %v658_v12 }
 0x3be   :  { %545 = vst.msk [vmem:[#allocation9] sm:$0xff] %vm482_vm8, %v542_v19 }
 0x3bf   :  { %v664_v20 = vpop.eup %663 }
 0x3c0   :  { %v544_v21 = vmul.f32 %v664_v20, %v660_v14 }
 0x3c2   :  { %546 = vst.msk [vmem:[#allocation9 + $0x8] sm:$0xff] %vm482_vm8, %v544_v21 }
 0x3c3   :  { %742 = shalt.err (!%p739_p0)
}
 0x3c4   :  { %s743_s27 = scalar_lea.hbm %s983_s3, 256 }
 0x3c5   :  { %p744_p1 = scmp.ne.s32.totalorder %s983_s3, %s743_s27  ;;  %p747_p2 = scmp.lt.u32.totalorder %s743_s27, %s983_s3 }
 0x3c7   :  { %p749_p3 = pnand %p747_p2, %p744_p1 }
 0x3c9   :  { %752 = shalt.err (!%p749_p3)
}
 0x3ca   :  { %558 = dma.vmem_to_hbm [thread:$0]  %s553_s21, 256, %s983_s3, [#allocation5], %s761_s24, %s761_s24, %s762_s25  }
 0x3cb   :  { %757 = dma.done.wait [#allocation5], 256  }
 0x3cc   :  { %758 = vsyncadd [#allocation5], 4294967040 }
 0x3cd   :  { %562 = vsyncpa [#allocation4], 1 }
 0x3ce   :  { %563 = vsyncpa [#allocation7], 1 }
 0x3cf   :  { %564 = vsyncpa [#allocation5], 1 }

</bundles_post_ra>
